<compile_context>
chip_gen: v7x
topology: tpu7x:2x2x1
jax: 0.10.0
libtpu: 0.0.40
codegen_flags: <defaults>
</compile_context>

<pallas_src>
import jax
import jax.numpy as jnp
from jax.experimental import pallas as pl
from jax.experimental.pallas import tpu as pltpu


_INV15 = 1.0 / 15.0


def quantize(w):
    """4-bit style quantization used by MDBBlock._quantize_weights."""
    return jnp.round(w * 15.0) / 15.0


def mdb_kernel(x_ref, w1_ref, b1_ref, w2_ref, b2_ref, wd_ref, bd_ref, out_ref):
    # Trunk is recomputed per vocab tile (tiny: E=32/H=64 contractions) so the
    # vocab axis carries no cross-step state and can run "parallel".
    x = x_ref[...]                                        # (BS, 2E)  f32

    # Exact dequant: int8 values are round(w*15); /15 reproduces round(w*15)/15.
    w1 = w1_ref[...].astype(jnp.float32) * _INV15         # (2E, H)
    h1 = jnp.maximum(
        jnp.dot(x, w1, preferred_element_type=jnp.float32) + b1_ref[...], 0.0)

    w2 = w2_ref[...].astype(jnp.float32) * _INV15         # (H, E)
    h = jnp.dot(h1, w2, preferred_element_type=jnp.float32) + b2_ref[...]

    wd = wd_ref[...].astype(jnp.float32) * _INV15         # (E, tile_v)
    out_ref[...] = (jnp.dot(h, wd, preferred_element_type=jnp.float32)
                    + bd_ref[...])                        # (BS, tile_v)


def _pick_tile_v(vocab, tile_v):
    if tile_v is not None:
        assert vocab % tile_v == 0 and tile_v % 128 == 0
        return tile_v
    if vocab <= 4096:
        return vocab                      # single grid step
    for cand in (4096, 2048, 1024, 512, 256, 128):
        if vocab % cand == 0:
            return cand
    raise ValueError("vocab size must be a multiple of 128")


def mdb_block_forward(x_t, x_prev, params, *, tile_v=None):
    emb = params['embedding']
    # Embedding lookup is a gather -> plain-JAX glue outside the kernel.
    xt_e = jnp.take(emb, x_t, axis=0).astype(jnp.float32)      # (B, S,  E)
    xp_e = jnp.take(emb, x_prev, axis=0).astype(jnp.float32)   # (B, Sp, E)

    B, S, E = xt_e.shape
    H = params['w1'].shape[1]
    V = params['wd'].shape[1]
    BS = B * S
    tile_v = _pick_tile_v(V, tile_v)
    n_tiles = V // tile_v

    # Context mean + lane-axis concat + batch flatten done as cheap wrapper
    # layout plumbing -> kernel sees one dense 2-D activation slab.
    xp_mean = jnp.mean(xp_e, axis=1, keepdims=True)            # (B, 1, E)
    x_in = jnp.concatenate(
        [xt_e, jnp.broadcast_to(xp_mean, xt_e.shape)], axis=-1
    ).reshape(BS, 2 * E)                                       # (BS, 2E)

    # Integer weight storage: params are already round(w*15)/15, so round(w*15)
    # fits comfortably in int8 and dequantizes exactly in-kernel.
    w1_i8 = jnp.round(params['w1'] * 15.0).astype(jnp.int8)
    w2_i8 = jnp.round(params['w2'] * 15.0).astype(jnp.int8)
    wd_i8 = jnp.round(params['wd'] * 15.0).astype(jnp.int8)

    out2d = pl.pallas_call(
        mdb_kernel,
        out_shape=jax.ShapeDtypeStruct((BS, V), jnp.float32),
        grid_spec=pltpu.PrefetchScalarGridSpec(
            num_scalar_prefetch=0,
            grid=(n_tiles,),
            in_specs=[
                pl.BlockSpec((BS, 2 * E), lambda j: (0, 0)),   # x_in (resident)
                pl.BlockSpec((2 * E, H), lambda j: (0, 0)),    # W1 int8
                pl.BlockSpec((1, H), lambda j: (0, 0)),        # b1
                pl.BlockSpec((H, E), lambda j: (0, 0)),        # W2 int8
                pl.BlockSpec((1, E), lambda j: (0, 0)),        # b2
                pl.BlockSpec((E, tile_v), lambda j: (0, j)),   # Wd tile int8
                pl.BlockSpec((1, tile_v), lambda j: (0, j)),   # bd tile
            ],
            out_specs=pl.BlockSpec((BS, tile_v), lambda j: (0, j)),
        ),
        compiler_params=pltpu.CompilerParams(
            dimension_semantics=("parallel",)),   # safe: no cross-tile state
    )(x_in, w1_i8, params['b1'], w2_i8, params['b2'], wd_i8, params['bd'])

    return out2d.reshape(B, S, V)


def reference_forward(x_t, x_prev, params):
    """Pure-JAX reference mirroring the PyTorch forward."""
    emb = params['embedding']
    xt_e = jnp.take(emb, x_t, axis=0)
    xp_e = jnp.take(emb, x_prev, axis=0)
    xp_mean = jnp.mean(xp_e, axis=1, keepdims=True)
    x_in = jnp.concatenate(
        [xt_e, jnp.broadcast_to(xp_mean, xt_e.shape)], axis=-1)
    h = jnp.maximum(x_in @ params['w1'] + params['b1'][0], 0.0)
    h = h @ params['w2'] + params['b2'][0]
    return h @ params['wd'] + params['bd'][0]


def init_params(key, vocab_size, embed_dim, hidden_dim):
    ks = jax.random.split(key, 7)
    p = {
        'embedding': jax.random.normal(ks[0], (vocab_size, embed_dim),
                                       jnp.float32) * 0.5,
        'w1': jax.random.normal(ks[1], (2 * embed_dim, hidden_dim),
                                jnp.float32) * 0.2,
        'b1': jax.random.normal(ks[2], (1, hidden_dim), jnp.float32) * 0.1,
        'w2': jax.random.normal(ks[3], (hidden_dim, embed_dim),
                                jnp.float32) * 0.2,
        'b2': jax.random.normal(ks[4], (1, embed_dim), jnp.float32) * 0.1,
        'wd': jax.random.normal(ks[5], (embed_dim, vocab_size),
                                jnp.float32) * 0.2,
        'bd': jax.random.normal(ks[6], (1, vocab_size), jnp.float32) * 0.1,
    }
    # tier='simple' -> _quantize_weights() applies to every parameter.
    return {k: quantize(v) for k, v in p.items()}


if __name__ == "__main__":
    # Small synthetic shapes consistent with the module's forward.
    B, S, Sp = 2, 8, 8
    EMBED_DIM, HIDDEN_DIM, VOCAB = 32, 64, 512

    key = jax.random.PRNGKey(0)
    k_param, k_xt, k_xp = jax.random.split(key, 3)

    params = init_params(k_param, VOCAB, EMBED_DIM, HIDDEN_DIM)
    x_t = jax.random.randint(k_xt, (B, S), 0, VOCAB, dtype=jnp.int32)
    x_prev = jax.random.randint(k_xp, (B, Sp), 0, VOCAB, dtype=jnp.int32)

    logits = mdb_block_forward(x_t, x_prev, params)
    logits = jax.block_until_ready(logits)

    ref = reference_forward(x_t, x_prev, params)
    assert logits.shape == (B, S, VOCAB)
    assert jnp.allclose(logits, ref, atol=1e-4, rtol=1e-4), \
        float(jnp.max(jnp.abs(logits - ref)))

    print("KERNEL_OK")
</pallas_src>

<mosaic_0001>
module attributes {stable_mosaic.version = 11 : i64} {
  func.func @mdb_kernel(%arg0: i32, %arg1: memref<16x64xf32, #tpu.memory_space<vmem>>, %arg2: memref<64x64xi8, #tpu.memory_space<vmem>>, %arg3: memref<1x64xf32, #tpu.memory_space<vmem>>, %arg4: memref<64x32xi8, #tpu.memory_space<vmem>>, %arg5: memref<1x32xf32, #tpu.memory_space<vmem>>, %arg6: memref<32x512xi8, #tpu.memory_space<vmem>>, %arg7: memref<1x512xf32, #tpu.memory_space<vmem>>, %arg8: memref<16x512xf32, #tpu.memory_space<vmem>>) attributes {dimension_semantics = [#tpu.dimension_semantics<parallel>], iteration_bounds = array<i64: 1>, scalar_prefetch = 0 : i64, scratch_operands = 0 : i64, tpu.core_type = #tpu.core_type<tc>, window_params = [{pipeline_mode = #tpu.pipeline_mode<synchronous>, transform_indices = @transform_0, window_bounds = array<i64: 16, 64>}, {pipeline_mode = #tpu.pipeline_mode<synchronous>, transform_indices = @transform_1, window_bounds = array<i64: 64, 64>}, {pipeline_mode = #tpu.pipeline_mode<synchronous>, transform_indices = @transform_2, window_bounds = array<i64: 1, 64>}, {pipeline_mode = #tpu.pipeline_mode<synchronous>, transform_indices = @transform_3, window_bounds = array<i64: 64, 32>}, {pipeline_mode = #tpu.pipeline_mode<synchronous>, transform_indices = @transform_4, window_bounds = array<i64: 1, 32>}, {transform_indices = @transform_5, window_bounds = array<i64: 32, 512>}, {transform_indices = @transform_6, window_bounds = array<i64: 1, 512>}, {transform_indices = @transform_7, window_bounds = array<i64: 16, 512>}]} {
    %c0 = arith.constant 0 : index
    %c0_0 = arith.constant 0 : index
    %0 = vector.load %arg1[%c0, %c0_0] : memref<16x64xf32, #tpu.memory_space<vmem>>, vector<16x64xf32>
    %c0_1 = arith.constant 0 : index
    %c0_2 = arith.constant 0 : index
    %1 = vector.load %arg2[%c0_1, %c0_2] : memref<64x64xi8, #tpu.memory_space<vmem>>, vector<64x64xi8>
    %2 = arith.sitofp %1 : vector<64x64xi8> to vector<64x64xf32>
    %cst = arith.constant 0.0666666701 : f32
    %3 = vector.broadcast %cst : f32 to vector<64x64xf32>
    %4 = arith.mulf %2, %3 : vector<64x64xf32>
    %cst_3 = arith.constant dense<0.000000e+00> : vector<16x64xf32>
    %5 = tpu.matmul %0, %4, %cst_3 {dimension_numbers = #tpu.dot_dimension_numbers<[1], [0], [0], [1], [0, 0, 1, 1], [], []>} : vector<16x64xf32>, vector<64x64xf32>, vector<16x64xf32> -> vector<16x64xf32>
    %c0_4 = arith.constant 0 : index
    %c0_5 = arith.constant 0 : index
    %6 = vector.load %arg3[%c0_4, %c0_5] : memref<1x64xf32, #tpu.memory_space<vmem>>, vector<1x64xf32>
    %7 = vector.broadcast %6 : vector<1x64xf32> to vector<16x64xf32>
    %8 = arith.addf %5, %7 : vector<16x64xf32>
    %cst_6 = arith.constant 0.000000e+00 : f32
    %9 = vector.broadcast %cst_6 : f32 to vector<16x64xf32>
    %10 = arith.maximumf %8, %9 : vector<16x64xf32>
    %c0_7 = arith.constant 0 : index
    %c0_8 = arith.constant 0 : index
    %11 = vector.load %arg4[%c0_7, %c0_8] : memref<64x32xi8, #tpu.memory_space<vmem>>, vector<64x32xi8>
    %12 = arith.sitofp %11 : vector<64x32xi8> to vector<64x32xf32>
    %cst_9 = arith.constant 0.0666666701 : f32
    %13 = vector.broadcast %cst_9 : f32 to vector<64x32xf32>
    %14 = arith.mulf %12, %13 : vector<64x32xf32>
    %cst_10 = arith.constant dense<0.000000e+00> : vector<16x32xf32>
    %15 = tpu.matmul %10, %14, %cst_10 {dimension_numbers = #tpu.dot_dimension_numbers<[1], [0], [0], [1], [0, 0, 1, 1], [], []>} : vector<16x64xf32>, vector<64x32xf32>, vector<16x32xf32> -> vector<16x32xf32>
    %c0_11 = arith.constant 0 : index
    %c0_12 = arith.constant 0 : index
    %16 = vector.load %arg5[%c0_11, %c0_12] : memref<1x32xf32, #tpu.memory_space<vmem>>, vector<1x32xf32>
    %17 = vector.broadcast %16 : vector<1x32xf32> to vector<16x32xf32>
    %18 = arith.addf %15, %17 : vector<16x32xf32>
    %c0_13 = arith.constant 0 : index
    %c0_14 = arith.constant 0 : index
    %19 = vector.load %arg6[%c0_13, %c0_14] : memref<32x512xi8, #tpu.memory_space<vmem>>, vector<32x512xi8>
    %20 = arith.sitofp %19 : vector<32x512xi8> to vector<32x512xf32>
    %cst_15 = arith.constant 0.0666666701 : f32
    %21 = vector.broadcast %cst_15 : f32 to vector<32x512xf32>
    %22 = arith.mulf %20, %21 : vector<32x512xf32>
    %cst_16 = arith.constant dense<0.000000e+00> : vector<16x512xf32>
    %23 = tpu.matmul %18, %22, %cst_16 {dimension_numbers = #tpu.dot_dimension_numbers<[1], [0], [0], [1], [0, 0, 1, 1], [], []>} : vector<16x32xf32>, vector<32x512xf32>, vector<16x512xf32> -> vector<16x512xf32>
    %c0_17 = arith.constant 0 : index
    %c0_18 = arith.constant 0 : index
    %24 = vector.load %arg7[%c0_17, %c0_18] : memref<1x512xf32, #tpu.memory_space<vmem>>, vector<1x512xf32>
    %25 = vector.broadcast %24 : vector<1x512xf32> to vector<16x512xf32>
    %26 = arith.addf %23, %25 : vector<16x512xf32>
    %c0_19 = arith.constant 0 : index
    %c0_20 = arith.constant 0 : index
    %27 = vector.load %arg8[%c0_19, %c0_20] : memref<16x512xf32, #tpu.memory_space<vmem>>, vector<16x512xf32>
    tpu.vector_store %arg8[%c0_19, %c0_20], %26 {strides = array<i32>} : memref<16x512xf32, #tpu.memory_space<vmem>>, vector<16x512xf32>,
    return
  }
  func.func @transform_0(%arg0: i32) -> (i32, i32) {
    %c0_i32 = arith.constant 0 : i32
    %c0_i32_0 = arith.constant 0 : i32
    %c0_i32_1 = arith.constant 0 : i32
    return %c0_i32, %c0_i32_0 : i32, i32
  }
  func.func @transform_1(%arg0: i32) -> (i32, i32) {
    %c0_i32 = arith.constant 0 : i32
    %c0_i32_0 = arith.constant 0 : i32
    %c0_i32_1 = arith.constant 0 : i32
    return %c0_i32, %c0_i32_0 : i32, i32
  }
  func.func @transform_2(%arg0: i32) -> (i32, i32) {
    %c0_i32 = arith.constant 0 : i32
    %c0_i32_0 = arith.constant 0 : i32
    %c0_i32_1 = arith.constant 0 : i32
    return %c0_i32, %c0_i32_0 : i32, i32
  }
  func.func @transform_3(%arg0: i32) -> (i32, i32) {
    %c0_i32 = arith.constant 0 : i32
    %c0_i32_0 = arith.constant 0 : i32
    %c0_i32_1 = arith.constant 0 : i32
    return %c0_i32, %c0_i32_0 : i32, i32
  }
  func.func @transform_4(%arg0: i32) -> (i32, i32) {
    %c0_i32 = arith.constant 0 : i32
    %c0_i32_0 = arith.constant 0 : i32
    %c0_i32_1 = arith.constant 0 : i32
    return %c0_i32, %c0_i32_0 : i32, i32
  }
  func.func @transform_5(%arg0: i32) -> (i32, i32) {
    %c0_i32 = arith.constant 0 : i32
    %c0_i32_0 = arith.constant 0 : i32
    return %c0_i32, %arg0 : i32, i32
  }
  func.func @transform_6(%arg0: i32) -> (i32, i32) {
    %c0_i32 = arith.constant 0 : i32
    %c0_i32_0 = arith.constant 0 : i32
    return %c0_i32, %arg0 : i32, i32
  }
  func.func @transform_7(%arg0: i32) -> (i32, i32) {
    %c0_i32 = arith.constant 0 : i32
    %c0_i32_0 = arith.constant 0 : i32
    return %c0_i32, %arg0 : i32, i32
  }
}

</mosaic_0001>

<bundles_post_ra>
// kernel: tpu_custom_call.1
= control target key start
LH: loop header
LB: loop body
LE: loop exit
PB: predicated region body
PF: predicated region fallthrough
CT: control target
= control target key end

     0   :  { %12 = vsyncpa [#allocation3], 0  ;;  %s860_s0 = inlined_call_operand.hbm [shape: f32[16,64], index: 0, kind: input, shape index: {}]   ;;  %s861_s1 = inlined_call_operand.hbm [shape: s8[64,64], index: 1, kind: input, shape index: {}]   ;;  %s862_s2 = inlined_call_operand.vmem [shape: f32[1,64], index: 2, kind: input, shape index: {}]   ;;  %s863_s3 = inlined_call_operand.vmem [shape: s8[64,32], index: 3, kind: input, shape index: {}]   ;;  %s864_s4 = inlined_call_operand.vmem [shape: f32[1,32], index: 4, kind: input, shape index: {}]   ;;  %s865_s5 = inlined_call_operand.vmem [shape: s8[32,512], index: 5, kind: input, shape index: {}]   ;;  %s866_s6 = inlined_call_operand.vmem [shape: f32[1,512], index: 6, kind: input, shape index: {}]   ;;  %s867_s7 = inlined_call_operand.hbm [shape: f32[16,512], index: 7, kind: output, shape index: {}]  }
   0x1   :  { %13 = vsyncpa [#allocation6], 0 }
   0x2   :  { %14 = vsyncpa [#allocation4], 0  ;;  %s745_s24 = smov [#allocation2]   ;;  %s673_s28 = scalar_lea.hbm %s860_s0, 256 }
   0x3   :  { %s20_s25 = sshll.u32 %s745_s24, 4  ;;  %p674_p0 = scmp.ne.s32.totalorder %s860_s0, %s673_s28  ;;  %s21_s25 = int_to_ptr.vmem [resolvable:$true] %s20_s25 }
   0x4   :  { %p677_p1 = scmp.lt.u32.totalorder %s673_s28, %s860_s0 }
   0x6   :  { %p679_p2 = pnand %p677_p1, %p674_p0 }
   0x8   :  { %682 = shalt.err (!%p679_p2)
}
   0x9   :  { %s683_s10 = scalar_lea.vmem %s21_s25, 256  ;;  %p688_p4 = scmp.lt.s32.totalorder %s21_s25, %s21_s25 }
   0xa   :  { %p684_p3 = scmp.ne.s32.totalorder %s21_s25, %s683_s10  ;;  %p689_p5 = scmp.lt.s32.totalorder %s683_s10, %s683_s10 }
   0xc   :  { %p690_p6 = por %p689_p5, %p688_p4 }
   0xe   :  { %p691_p7 = pnand %p690_p6, %p684_p3 }
  0x10   :  { %694 = shalt.err (!%p691_p7)
}
  0x11   :  { %s746_s11 = smov 128   ;;  %s747_s12 = smov 8  }
  0x12   :  { %26 = dma.hbm_to_vmem [thread:$0]  %s860_s0, 256, %s21_s25, [#allocation3], %s746_s11, %s746_s11, %s747_s12  }
  0x13   :  { %s748_s15 = smov [#allocation5]   ;;  %s695_s19 = scalar_lea.hbm %s861_s1, 256 }
  0x14   :  { %s32_s16 = sshll.u32 %s748_s15, 4  ;;  %p696_p8 = scmp.ne.s32.totalorder %s861_s1, %s695_s19  ;;  %s33_s16 = int_to_ptr.vmem [resolvable:$true] %s32_s16 }
  0x15   :  { %p699_p9 = scmp.lt.u32.totalorder %s695_s19, %s861_s1 }
  0x17   :  { %p701_p10 = pnand %p699_p9, %p696_p8 }
  0x19   :  { %704 = shalt.err (!%p701_p10)
}
  0x1a   :  { %s705_s24 = scalar_lea.vmem %s33_s16, 256  ;;  %p710_p12 = scmp.lt.s32.totalorder %s33_s16, %s33_s16 }
  0x1b   :  { %p706_p11 = scmp.ne.s32.totalorder %s33_s16, %s705_s24  ;;  %p711_p13 = scmp.lt.s32.totalorder %s705_s24, %s705_s24 }
  0x1d   :  { %p712_p0 = por %p711_p13, %p710_p12 }
  0x1f   :  { %p713_p1 = pnand %p712_p0, %p706_p11 }
  0x21   :  { %716 = shalt.err (!%p713_p1)
}
  0x22   :  { %38 = dma.hbm_to_vmem [thread:$0]  %s861_s1, 256, %s33_s16, [#allocation6], %s746_s11, %s746_s11, %s747_s12  }
  0x23   :  { %739 = dma.done.wait [#allocation3], 256  }
  0x24   :  { %740 = vsyncadd [#allocation3], 4294967040 }
  0x25   :  { %741 = dma.done.wait [#allocation6], 256  }
  0x26   :  { %742 = vsyncadd [#allocation6], 4294967040  ;;  %vm90_vm0 = vcmask 523264   ;;  %v57_v0 = vld [vmem:[#allocation5] sm:$0xff]  ;;  %v58_v1 = vld [vmem:[#allocation5 + $0x8] sm:$0xff]  ;;  %vm362_vm1 = vcmask 261120  }
  0x27   :  { %v55_v2 = vld [vmem:[#allocation2] sm:$0xff]  ;;  %v59_v3 = vunpack.c.0.s8 %v57_v0  ;;  %v60_v4 = vunpack.c.1.s8 %v57_v0  ;;  %v61_v5 = vunpack.c.2.s8 %v57_v0  ;;  %v62_v6 = vunpack.c.3.s8 %v57_v0  ;;  %v175_v26 = vld [vmem:[%s863_s3 + $0x8] sm:$0xff]  ;;  %v291_v63 = vld [vmem:[%s865_s5 + $0x18] sm:$0xff] }
  0x28   :  { %595 = vmatprep.mubr.msk.f32.mxu0 %vm90_vm0, %v55_v2  ;;  %v63_v7 = vunpack.c.0.s8 %v58_v1  ;;  %v64_v8 = vunpack.c.1.s8 %v58_v1  ;;  %v65_v9 = vunpack.c.2.s8 %v58_v1  ;;  %v66_v10 = vunpack.c.3.s8 %v58_v1  ;;  %v174_v11 = vld [vmem:[%s863_s3] sm:$0xff]  ;;  %v56_v54 = vld [vmem:[#allocation2 + $0x8] sm:$0xff] }
  0x29   :  { %v67_v12 = vcvt.s32.f32 %v59_v3  ;;  %v68_v13 = vcvt.s32.f32 %v60_v4  ;;  %v69_v14 = vcvt.s32.f32 %v61_v5  ;;  %v70_v15 = vcvt.s32.f32 %v62_v6  ;;  %v289_v62 = vld [vmem:[%s865_s5 + $0x8] sm:$0xff]  ;;  %v288_v0 = vld [vmem:[%s865_s5] sm:$0xff] }
  0x2a   :  { %v71_v16 = vcvt.s32.f32 %v63_v7  ;;  %v72_v17 = vcvt.s32.f32 %v64_v8  ;;  %v176_v21 = vunpack.c.0.s8 %v174_v11  ;;  %v73_v23 = vcvt.s32.f32 %v65_v9 }
  0x2b   :  { %v75_v18 = vmul.f32 0.06666667, %v67_v12  ;;  %v76_v19 = vmul.f32 0.06666667, %v68_v13  ;;  %v77_v20 = vmul.f32 0.06666667, %v69_v14  ;;  %v74_v24 = vcvt.s32.f32 %v66_v10 }
  0x2c   :  { %v78_v22 = vmul.f32 0.06666667, %v70_v15  ;;  %v177_v25 = vunpack.c.1.s8 %v174_v11  ;;  %v79_v28 = vmul.f32 0.06666667, %v71_v16  ;;  %v80_v29 = vmul.f32 0.06666667, %v72_v17 }
  0x2d   :  { %v617_v27 = vpack.c.bf16 %v76_v19, %v75_v18  ;;  %v184_v30 = vcvt.s32.f32 %v176_v21  ;;  %v178_v33 = vunpack.c.2.s8 %v174_v11  ;;  %v179_v35 = vunpack.c.3.s8 %v174_v11 }
  0x2e   :  { %v621_v31 = vpack.c.bf16 %v78_v22, %v77_v20  ;;  %v185_v32 = vcvt.s32.f32 %v177_v25  ;;  %v180_v36 = vunpack.c.0.s8 %v175_v26  ;;  %v81_v37 = vmul.f32 0.06666667, %v73_v23  ;;  %v290_v22 = vld [vmem:[%s865_s5 + $0x10] sm:$0xff] }
  0x2f   :  { %618 = vmatprep.subr.bf16.mxu0 %v617_v27  ;;  %v192_v34 = vmul.f32 0.06666667, %v184_v30  ;;  %v186_v39 = vcvt.s32.f32 %v178_v33  ;;  %v181_v40 = vunpack.c.1.s8 %v175_v26  ;;  %v625_v41 = vpack.c.bf16 %v80_v29, %v79_v28 }
  0x30   :  { %620 = vmatpush3.bf16.msra.mxu0 %v617_v27  ;;  %v193_v38 = vmul.f32 0.06666667, %v185_v32  ;;  %v82_v42 = vmul.f32 0.06666667, %v74_v24  ;;  %v187_v43 = vcvt.s32.f32 %v179_v35  ;;  %v188_v44 = vcvt.s32.f32 %v180_v36  ;;  %v549_v27 = vld [vmem:[%s862_s2] ss:$0 sm:$0xff] }
  0x31   :  { %622 = vmatprep.subr.bf16.mxu0 %v621_v31  ;;  %v194_v46 = vmul.f32 0.06666667, %v186_v39  ;;  %v189_v47 = vcvt.s32.f32 %v181_v40  ;;  %v182_v55 = vunpack.c.2.s8 %v175_v26  ;;  %v183_v56 = vunpack.c.3.s8 %v175_v26 }
  0x32   :  { %v633_v45 = vpack.c.bf16 %v193_v38, %v192_v34  ;;  %v195_v48 = vmul.f32 0.06666667, %v187_v43  ;;  %v196_v49 = vmul.f32 0.06666667, %v188_v44  ;;  %v629_v51 = vpack.c.bf16 %v82_v42, %v81_v37 }
  0x33   :  { %v197_v50 = vmul.f32 0.06666667, %v189_v47  ;;  %v190_v57 = vcvt.s32.f32 %v182_v55  ;;  %v191_v58 = vcvt.s32.f32 %v183_v56  ;;  %v293_v1 = vunpack.c.0.s8 %v289_v62 }
  0x34   :  { %624 = vmatpush3.bf16.msra.mxu0 %v621_v31  ;;  %634 = vmatprep.subr.bf16.mxu1 %v633_v45  ;;  %v637_v52 = vpack.c.bf16 %v195_v48, %v194_v46  ;;  %v297_v2 = vunpack.c.1.s8 %v289_v62  ;;  %v295_v3 = vunpack.c.0.s8 %v291_v63  ;;  %v299_v4 = vunpack.c.1.s8 %v291_v63 }
  0x35   :  { %626 = vmatprep.subr.bf16.mxu0 %v625_v41  ;;  %636 = vmatpush3.bf16.msra.mxu1 %v633_v45  ;;  %v641_v53 = vpack.c.bf16 %v197_v50, %v196_v49  ;;  %v198_v59 = vmul.f32 0.06666667, %v190_v57  ;;  %v199_v60 = vmul.f32 0.06666667, %v191_v58  ;;  %v292_v5 = vunpack.c.0.s8 %v288_v0 }
  0x36   :  { %638 = vmatprep.subr.bf16.mxu1 %v637_v52  ;;  %v296_v6 = vunpack.c.1.s8 %v288_v0  ;;  %v309_v7 = vcvt.s32.f32 %v293_v1  ;;  %v313_v8 = vcvt.s32.f32 %v297_v2  ;;  %v311_v9 = vcvt.s32.f32 %v295_v3  ;;  %v552_v2 = vld [vmem:[%s864_s4] ss:$0 sm:$0xff]  ;;  %s750_s4 = smov [#allocation7]  }
  0x37   :  { %v645_v61 = vpack.c.bf16 %v199_v60, %v198_v59  ;;  %v315_v10 = vcvt.s32.f32 %v299_v4  ;;  %v308_v11 = vcvt.s32.f32 %v292_v5  ;;  %v294_v23 = vunpack.c.0.s8 %v290_v22  ;;  %s536_s17 = sshll.u32 %s750_s4, 4  ;;  %s537_s17 = int_to_ptr.vmem [resolvable:$true] %s536_s17 }
  0x38   :  { %628 = vmatpush3.bf16.msra.mxu0 %v625_v41  ;;  %v312_v12 = vcvt.s32.f32 %v296_v6  ;;  %v325_v13 = vmul.f32 0.06666667, %v309_v7  ;;  %v329_v14 = vmul.f32 0.06666667, %v313_v8  ;;  %v327_v15 = vmul.f32 0.06666667, %v311_v9  ;;  %p722_p3 = scmp.lt.s32.totalorder %s537_s17, %s537_s17 }
  0x39   :  { %630 = vmatprep.subr.bf16.mxu0 %v629_v51  ;;  %640 = vmatpush3.bf16.msra.mxu1 %v637_v52  ;;  %v331_v16 = vmul.f32 0.06666667, %v315_v10  ;;  %v324_v17 = vmul.f32 0.06666667, %v308_v11  ;;  %v298_v24 = vunpack.c.1.s8 %v290_v22  ;;  %v310_v25 = vcvt.s32.f32 %v294_v23  ;;  %v340_v11 = vld [vmem:[%s866_s6] sm:$0xf] }
  0x3a   :  { %642 = vmatprep.subr.bf16.mxu1 %v641_v53  ;;  %v328_v18 = vmul.f32 0.06666667, %v312_v12  ;;  %v649_v19 = vpack.c.bf16 %v329_v14, %v325_v13  ;;  %v301_v37 = vunpack.c.2.s8 %v289_v62  ;;  %v305_v38 = vunpack.c.3.s8 %v289_v62  ;;  %s717_s6 = scalar_lea.vmem %s537_s17, 1024 }
  0x3b   :  { %v657_v20 = vpack.c.bf16 %v331_v16, %v327_v15  ;;  %v314_v26 = vcvt.s32.f32 %v298_v24  ;;  %v326_v29 = vmul.f32 0.06666667, %v310_v25  ;;  %v303_v39 = vunpack.c.2.s8 %v291_v63  ;;  %p718_p2 = scmp.ne.s32.totalorder %s537_s17, %s717_s6  ;;  %p723_p4 = scmp.lt.s32.totalorder %s717_s6, %s717_s6 }
  0x3c   :  { %632 = vmatpush3.bf16.msra.mxu0 %v629_v51  ;;  %v651_v21 = vpack.c.bf16 %v328_v18, %v324_v17  ;;  %v307_v40 = vunpack.c.3.s8 %v291_v63  ;;  %v300_v41 = vunpack.c.2.s8 %v288_v0  ;;  %v304_v42 = vunpack.c.3.s8 %v288_v0 }
  0x3d   :  { %644 = vmatpush3.bf16.msra.mxu1 %v641_v53  ;;  %650 = vmatprep.subr.bf16.mxu0 %v649_v19  ;;  %v330_v30 = vmul.f32 0.06666667, %v314_v26  ;;  %v302_v43 = vunpack.c.2.s8 %v290_v22  ;;  %v306_v44 = vunpack.c.3.s8 %v290_v22  ;;  %v317_v45 = vcvt.s32.f32 %v301_v37  ;;  %p724_p5 = por %p723_p4, %p722_p3 }
  0x3e   :  { %646 = vmatprep.subr.bf16.mxu1 %v645_v61  ;;  %v321_v46 = vcvt.s32.f32 %v305_v38  ;;  %v319_v47 = vcvt.s32.f32 %v303_v39  ;;  %v323_v48 = vcvt.s32.f32 %v307_v40  ;;  %v316_v49 = vcvt.s32.f32 %v300_v41 }
  0x3f   :  { %596 = vmatmul.mubr.msk.f32.vlgmr.msra.gmra.mrb[0].mxu0 %vm90_vm0, %v56_v54  ;;  %v659_v35 = vpack.c.bf16 %v330_v30, %v326_v29  ;;  %v320_v50 = vcvt.s32.f32 %v304_v42  ;;  %v318_v51 = vcvt.s32.f32 %v302_v43  ;;  %v322_v52 = vcvt.s32.f32 %v306_v44  ;;  %p725_p6 = pnand %p724_p5, %p718_p2 }
  0x40   :  { %652 = vmatpush1.bf16.msra.mxu0 %v651_v21  ;;  %v333_v53 = vmul.f32 0.06666667, %v317_v45  ;;  %v337_v54 = vmul.f32 0.06666667, %v321_v46  ;;  %v335_v55 = vmul.f32 0.06666667, %v319_v47  ;;  %v342_v7 = vlaneseq }
  0x41   :  { %648 = vmatpush3.bf16.msra.mxu1 %v645_v61  ;;  %v339_v56 = vmul.f32 0.06666667, %v323_v48  ;;  %v332_v57 = vmul.f32 0.06666667, %v316_v49  ;;  %v336_v58 = vmul.f32 0.06666667, %v320_v50 }
  0x42   :  { %658 = vmatprep.subr.bf16.mxu1 %v657_v20  ;;  %v653_v59 = vpack.c.bf16 %v337_v54, %v333_v53  ;;  %v334_v60 = vmul.f32 0.06666667, %v318_v51  ;;  %v338_v61 = vmul.f32 0.06666667, %v322_v52  ;;  %v749_v1 = vmov 0.0  }
  0x43   :  { %v661_v62 = vpack.c.bf16 %v339_v56, %v335_v55  ;;  %v655_v63 = vpack.c.bf16 %v336_v58, %v332_v57  ;;  %433 = vmatprep.mubr.f32.mxu0 %v749_v1  ;;  %v343_v8 = vshrl.u32 %v342_v7, 7 }
  0x44   :  { %654 = vmatprep.subr.bf16.mxu0 %v653_v59  ;;  %v663_v0 = vpack.c.bf16 %v338_v61, %v334_v60 }
  0x45   :  { %656 = vmatpush1.bf16.msra.mxu0 %v655_v63  ;;  %v344_v9 = vsub.s32 0, %v343_v8  ;;  %v352_v10 = vsub.s32 2, %v343_v8  ;;  %v348_v12 = vsub.s32 1, %v343_v8  ;;  %v356_v13 = vsub.s32 3, %v343_v8 }
  0x47   :  { %v345_v14 = vrot.slane %v340_v11, %v344_v9  ;;  %v353_v15 = vrot.slane %v340_v11, %v352_v10  ;;  %v349_v16 = vrot.slane %v340_v11, %v348_v12  ;;  %v357_v17 = vrot.slane %v340_v11, %v356_v13 }
 0x112   :  { %v597_v28 = vpop.f32.mrb[0].mxu0 }
 0x113   :  { %v169_v31 = vadd.f32 %v597_v28, %v549_v27  ;;  %v163_v32 = vpop.f32.mrb[1].mxu0 }
 0x114   :  { %v164_v33 = vadd.f32 %v549_v27, %v163_v32 }
 0x115   :  { %v173_v36 = vmax.f32 %v169_v31, 0.0 }
 0x116   :  { %v172_v34 = vmax.f32 %v164_v33, 0.0 }
 0x118   :  { %614 = vmatprep.mubr.msk.f32.mxu1 %vm90_vm0, %v172_v34 }
 0x119   :  { %615 = vmatmul.mubr.msk.f32.vlgmr.msra.gmra.mrb[0].mxu1 %vm90_vm0, %v173_v36 }
 0x11a   :  { %660 = vmatpush1.bf16.msra.mxu1 %v659_v35  ;;  %510 = vmatprep.mubr.f32.mxu1 %v749_v1 }
 0x11b   :  { %662 = vmatprep.subr.bf16.mxu1 %v661_v62 }
 0x11e   :  { %664 = vmatpush1.bf16.msra.mxu1 %v663_v0 }
 0x1ec   :  { %v616_v3 = vpop.f32.mrb[0].mxu1 }
 0x1ed   :  { %v279_v4 = vpop.f32.mrb[1].mxu1  ;;  %v285_v6 = vadd.f32 %v616_v3, %v552_v2 }
 0x1ee   :  { %v280_v5 = vadd.f32 %v552_v2, %v279_v4 }
 0x1f0   :  { %555 = vmatmul.mubr.msk.f32.vlgmr.msra.gmra.mrb[2].mxu0 %vm362_vm1, %v280_v5  ;;  %557 = vmatmul.mubr.msk.f32.vlgmr.msra.gmra.mrb[2].mxu1 %vm362_vm1, %v280_v5 }
 0x1f1   :  { %439 = vmatprep.mubr.f32.mxu0 %v749_v1  ;;  %516 = vmatprep.mubr.f32.mxu1 %v749_v1 }
 0x1f4   :  { %556 = vmatmul.mubr.msk.f32.gmra.mrb[4].mxu0 %vm362_vm1, %v285_v6  ;;  %558 = vmatmul.mubr.msk.f32.gmra.mrb[4].mxu1 %vm362_vm1, %v285_v6 }
 0x2c3   :  { %v435_v18 = vpop.f32.mrb[2].mxu0  ;;  %v512_v19 = vpop.f32.mrb[2].mxu1 }
 0x2c4   :  { %v436_v20 = vadd.f32 %v435_v18, %v345_v14  ;;  %v513_v21 = vadd.f32 %v512_v19, %v353_v15  ;;  %v437_v22 = vpop.f32.mrb[3].mxu0  ;;  %v514_v23 = vpop.f32.mrb[3].mxu1 }
 0x2c5   :  { %v438_v24 = vadd.f32 %v437_v22, %v349_v16  ;;  %v515_v25 = vadd.f32 %v514_v23, %v357_v17 }
 0x2c6   :  { %523 = vst [vmem:[#allocation7] sm:$0xff] %v436_v20  ;;  %525 = vst [vmem:[#allocation7 + $0x10] sm:$0xff] %v513_v21 }
 0x2c7   :  { %524 = vst [vmem:[#allocation7 + $0x8] sm:$0xff] %v438_v24  ;;  %526 = vst [vmem:[#allocation7 + $0x18] sm:$0xff] %v515_v25  ;;  %v441_v26 = vpop.f32.mrb[4].mxu0  ;;  %v518_v27 = vpop.f32.mrb[4].mxu1 }
 0x2c8   :  { %v442_v28 = vadd.f32 %v441_v26, %v345_v14  ;;  %v519_v29 = vadd.f32 %v518_v27, %v353_v15  ;;  %v443_v30 = vpop.f32.mrb[5].mxu0  ;;  %v520_v31 = vpop.f32.mrb[5].mxu1 }
 0x2c9   :  { %v444_v32 = vadd.f32 %v443_v30, %v349_v16  ;;  %v521_v33 = vadd.f32 %v520_v31, %v357_v17 }
 0x2ca   :  { %527 = vst [vmem:[#allocation7 + $0x20] sm:$0xff] %v442_v28  ;;  %529 = vst [vmem:[#allocation7 + $0x30] sm:$0xff] %v519_v29 }
 0x2cb   :  { %528 = vst [vmem:[#allocation7 + $0x28] sm:$0xff] %v444_v32  ;;  %530 = vst [vmem:[#allocation7 + $0x38] sm:$0xff] %v521_v33 }
 0x2cc   :  { %728 = shalt.err (!%p725_p6)
}
 0x2cd   :  { %s729_s20 = scalar_lea.hbm %s867_s7, 1024 }
 0x2ce   :  { %p730_p7 = scmp.ne.s32.totalorder %s867_s7, %s729_s20  ;;  %p733_p8 = scmp.lt.u32.totalorder %s729_s20, %s867_s7 }
 0x2d0   :  { %p735_p9 = pnand %p733_p8, %p730_p7 }
 0x2d2   :  { %738 = shalt.err (!%p735_p9)
}
 0x2d3   :  { %s751_s0 = smov 512   ;;  %s752_s25 = smov 32  }
 0x2d4   :  { %542 = dma.vmem_to_hbm [thread:$0]  %s537_s17, 1024, %s867_s7, [#allocation4], %s751_s0, %s751_s0, %s752_s25  }
 0x2d5   :  { %743 = dma.done.wait [#allocation4], 1024  }
 0x2d6   :  { %744 = vsyncadd [#allocation4], 4294966272 }
 0x2d7   :  { %546 = vsyncpa [#allocation3], 1 }
 0x2d8   :  { %547 = vsyncpa [#allocation6], 1 }
 0x2d9   :  { %548 = vsyncpa [#allocation4], 1 }

</bundles_post_ra>
